<compile_context>
chip_gen: v6e
topology: v6e:2x2x1
jax: 0.10.0
libtpu: 0.0.40
codegen_flags: <defaults>
</compile_context>

<pallas_src>
import functools

import jax
import jax.numpy as jnp
from jax.experimental import pallas as pl
from jax.experimental.pallas import tpu as pltpu


def _layer_mode(fan_in, fan_out, is_last):
    """Static per-layer compute-path decision (shared by wrapper and kernel)."""
    if fan_in <= 4:
        return "fma"      # tiny-K layer: VPU broadcast-FMAs, skip the MXU
    if is_last and fan_out == 1:
        return "reduce"   # tiny-N output layer: multiply + sublane reduce
    return "mxu"          # regular MXU matmul


def _mlp_kernel(layer_dims, *refs):
    """Transposed-layout MLP forward for one batch tile.

    refs = (x_ref, w0_ref, b0_ref, ..., w_{L-1}_ref, b_{L-1}_ref, out_ref)
      x_ref:                   [in_dim, TB]   (batch on lanes)
      w_i ("mxu"/"fma" mode):  [fan_out, fan_in]   (PyTorch nn.Linear layout)
      w_i ("reduce" mode):     [fan_in, 1]         (pre-transposed in wrapper)
      b_i:                     [fan_out, 1]        (broadcasts along lanes)
      out_ref:                 [out_dim, TB]
    """
    x_ref = refs[0]
    out_ref = refs[-1]
    wb = refs[1:-1]

    n_layers = len(layer_dims)
    h = x_ref[...]  # already f32; cast hoisted into the wrapper

    for i, (fan_in, fan_out) in enumerate(layer_dims):
        w = wb[2 * i][...]
        b = wb[2 * i + 1][...]
        last = i == n_layers - 1
        mode = _layer_mode(fan_in, fan_out, last)

        if mode == "fma":
            # K<=4: broadcast FMAs on the VPU beat an MXU push/drain.
            z = b
            for k in range(fan_in):
                z = z + w[:, k:k + 1] * h[k:k + 1, :]
        elif mode == "reduce":
            # N==1 output layer: elementwise multiply + sublane (XLU) reduce.
            z = jnp.sum(w * h, axis=0, keepdims=True) + b
        else:
            # Dense hidden layer on the MXU; batch (TB) is the lane dim.
            z = jnp.dot(w, h, preferred_element_type=jnp.float32) + b

        h = z if last else jnp.tanh(z)  # EUP tanh; no activation on last layer

    out_ref[...] = h.astype(out_ref.dtype)


def init_mlp_params(key, lst):
    """torch.nn.Linear-style init: W [fan_out, fan_in], b [fan_out], U(-k, k)."""
    params = []
    for fan_in, fan_out in zip(lst[:-1], lst[1:]):
        key, kw, kb = jax.random.split(key, 3)
        bound = 1.0 / (fan_in ** 0.5)
        w = jax.random.uniform(kw, (fan_out, fan_in), jnp.float32, -bound, bound)
        b = jax.random.uniform(kb, (fan_out,), jnp.float32, -bound, bound)
        params.append((w, b))
    return params


def mlp_forward(x, params, *, tile_batch=256):
    """Full MLP forward in a single Pallas call, gridded over batch tiles.

    x: [batch, in_dim]; params: list of (W [out, in], b [out]). Returns
    [batch, out_dim]. The wrapper transposes so batch is the lane axis and
    zero-pads it to a multiple of the (128-aligned) batch tile.
    """
    # TODO(synk): raise tile_batch (512-1024) for production-size collocation
    # batches and set vmem_limit_bytes if hidden widths grow enough to press
    # v7x's 64 MiB VMEM; at this model size the defaults are ample.
    n_layers = len(params)
    layer_dims = tuple((int(w.shape[1]), int(w.shape[0])) for w, _ in params)
    in_dim = layer_dims[0][0]
    out_dim = layer_dims[-1][1]

    batch = x.shape[0]
    # Keep the tile a multiple of 128 (lane width) but no larger than needed.
    tb = max(128, min(tile_batch, ((batch + 127) // 128) * 128))
    n_tiles = pl.cdiv(batch, tb)
    padded = n_tiles * tb

    # Batch onto the lane axis; pad to a whole number of tiles.
    xt = x.astype(jnp.float32).T                       # [in_dim, batch]
    if padded != batch:
        xt = jnp.pad(xt, ((0, 0), (0, padded - batch)))

    flat_args = []
    param_specs = []
    for i, (w, b) in enumerate(params):
        fan_in, fan_out = layer_dims[i]
        mode = _layer_mode(fan_in, fan_out, i == n_layers - 1)
        w_arg = w.astype(jnp.float32)
        if mode == "reduce":
            w_arg = w_arg.T                            # [fan_in, 1]
        b_arg = b.astype(jnp.float32).reshape(fan_out, 1)
        flat_args += [w_arg, b_arg]
        # Constant index_map: params fetched once, VMEM-resident across grid.
        param_specs += [
            pl.BlockSpec(w_arg.shape, lambda gi: (0, 0)),
            pl.BlockSpec(b_arg.shape, lambda gi: (0, 0)),
        ]

    x_spec = pl.BlockSpec((in_dim, tb), lambda gi: (0, gi))
    out_spec = pl.BlockSpec((out_dim, tb), lambda gi: (0, gi))

    kernel = functools.partial(_mlp_kernel, layer_dims)
    out_t = pl.pallas_call(
        kernel,
        out_shape=jax.ShapeDtypeStruct((out_dim, padded), jnp.float32),
        grid=(n_tiles,),
        in_specs=[x_spec] + param_specs,
        out_specs=out_spec,
        compiler_params=pltpu.CompilerParams(
            # Batch tiles are independent -> shard across TensorCores on v7x.
            dimension_semantics=("parallel",),
        ),
    )(xt, *flat_args)

    return out_t[:, :batch].T.astype(x.dtype)          # back to [batch, out_dim]


def mlp_forward_ref(x, params):
    """Pure-JAX reference (PyTorch semantics: h @ W^T + b, Tanh between)."""
    h = x.astype(jnp.float32)
    n = len(params)
    for i, (w, b) in enumerate(params):
        h = jnp.dot(h, w.T, precision=jax.lax.Precision.HIGHEST) + b
        if i < n - 1:
            h = jnp.tanh(h)
    return h.astype(x.dtype)


if __name__ == "__main__":
    # Sine-Gordon PINN architecture: (x, t) -> u.
    lst = [2, 32, 32, 1]

    key = jax.random.PRNGKey(0)
    key, kp = jax.random.split(key)
    params = init_mlp_params(kp, lst)

    # 512 exercises the multi-tile path; 200 exercises the batch-padding path.
    for batch in (512, 200):
        key, kx = jax.random.split(key)
        x = jax.random.normal(kx, (batch, lst[0]), dtype=jnp.float32)

        out = jax.block_until_ready(mlp_forward(x, params))
        ref = mlp_forward_ref(x, params)

        assert out.shape == (batch, lst[-1]), out.shape
        err = float(jnp.max(jnp.abs(out - ref)))
        # Tolerance leaves headroom for the hidden-layer MXU contraction being
        # run at default (possibly bf16-pass) precision vs the f32 reference;
        # structural bugs would produce errors orders of magnitude larger.
        assert jnp.allclose(out, ref, atol=2e-3, rtol=2e-3), err

    print("KERNEL_OK")
</pallas_src>

<mosaic_0001>
module attributes {stable_mosaic.version = 11 : i64} {
  func.func @_mlp_kernel(%arg0: i32, %arg1: memref<2x256xf32, #tpu.memory_space<vmem>>, %arg2: memref<32x2xf32, #tpu.memory_space<vmem>>, %arg3: memref<32x1xf32, #tpu.memory_space<vmem>>, %arg4: memref<32x32xf32, #tpu.memory_space<vmem>>, %arg5: memref<32x1xf32, #tpu.memory_space<vmem>>, %arg6: memref<32x1xf32, #tpu.memory_space<vmem>>, %arg7: memref<1x1xf32, #tpu.memory_space<vmem>>, %arg8: memref<1x256xf32, #tpu.memory_space<vmem>>) attributes {dimension_semantics = [#tpu.dimension_semantics<parallel>], iteration_bounds = array<i64: 2>, scalar_prefetch = 0 : i64, scratch_operands = 0 : i64, tpu.core_type = #tpu.core_type<tc>, window_params = [{transform_indices = @transform_0, window_bounds = array<i64: 2, 256>}, {pipeline_mode = #tpu.pipeline_mode<synchronous>, transform_indices = @transform_1, window_bounds = array<i64: 32, 2>}, {pipeline_mode = #tpu.pipeline_mode<synchronous>, transform_indices = @transform_2, window_bounds = array<i64: 32, 1>}, {pipeline_mode = #tpu.pipeline_mode<synchronous>, transform_indices = @transform_3, window_bounds = array<i64: 32, 32>}, {pipeline_mode = #tpu.pipeline_mode<synchronous>, transform_indices = @transform_4, window_bounds = array<i64: 32, 1>}, {pipeline_mode = #tpu.pipeline_mode<synchronous>, transform_indices = @transform_5, window_bounds = array<i64: 32, 1>}, {pipeline_mode = #tpu.pipeline_mode<synchronous>, transform_indices = @transform_6, window_bounds = array<i64: 1, 1>}, {transform_indices = @transform_7, window_bounds = array<i64: 1, 256>}]} {
    %c0 = arith.constant 0 : index
    %c0_0 = arith.constant 0 : index
    %0 = vector.load %arg1[%c0, %c0_0] : memref<2x256xf32, #tpu.memory_space<vmem>>, vector<2x256xf32>
    %c0_1 = arith.constant 0 : index
    %c0_2 = arith.constant 0 : index
    %1 = vector.load %arg2[%c0_1, %c0_2] : memref<32x2xf32, #tpu.memory_space<vmem>>, vector<32x2xf32>
    %c0_3 = arith.constant 0 : index
    %c0_4 = arith.constant 0 : index
    %2 = vector.load %arg3[%c0_3, %c0_4] : memref<32x1xf32, #tpu.memory_space<vmem>>, vector<32x1xf32>
    %3 = vector.extract_strided_slice %1 {offsets = [0, 0], sizes = [32, 1], strides = [1, 1]} : vector<32x2xf32> to vector<32x1xf32>
    %4 = vector.extract_strided_slice %0 {offsets = [0, 0], sizes = [1, 256], strides = [1, 1]} : vector<2x256xf32> to vector<1x256xf32>
    %5 = vector.broadcast %3 : vector<32x1xf32> to vector<32x256xf32>
    %6 = vector.broadcast %4 : vector<1x256xf32> to vector<32x256xf32>
    %7 = arith.mulf %5, %6 : vector<32x256xf32>
    %8 = vector.broadcast %2 : vector<32x1xf32> to vector<32x256xf32>
    %9 = arith.addf %8, %7 : vector<32x256xf32>
    %10 = vector.extract_strided_slice %1 {offsets = [0, 1], sizes = [32, 1], strides = [1, 1]} : vector<32x2xf32> to vector<32x1xf32>
    %11 = vector.extract_strided_slice %0 {offsets = [1, 0], sizes = [1, 256], strides = [1, 1]} : vector<2x256xf32> to vector<1x256xf32>
    %12 = vector.broadcast %10 : vector<32x1xf32> to vector<32x256xf32>
    %13 = vector.broadcast %11 : vector<1x256xf32> to vector<32x256xf32>
    %14 = arith.mulf %12, %13 : vector<32x256xf32>
    %15 = arith.addf %9, %14 : vector<32x256xf32>
    %16 = math.tanh %15 : vector<32x256xf32>
    %c0_5 = arith.constant 0 : index
    %c0_6 = arith.constant 0 : index
    %17 = vector.load %arg4[%c0_5, %c0_6] : memref<32x32xf32, #tpu.memory_space<vmem>>, vector<32x32xf32>
    %c0_7 = arith.constant 0 : index
    %c0_8 = arith.constant 0 : index
    %18 = vector.load %arg5[%c0_7, %c0_8] : memref<32x1xf32, #tpu.memory_space<vmem>>, vector<32x1xf32>
    %cst = arith.constant dense<0.000000e+00> : vector<32x256xf32>
    %19 = tpu.matmul %17, %16, %cst {dimension_numbers = #tpu.dot_dimension_numbers<[1], [0], [0], [1], [0, 0, 1, 1], [], []>} : vector<32x32xf32>, vector<32x256xf32>, vector<32x256xf32> -> vector<32x256xf32>
    %20 = vector.broadcast %18 : vector<32x1xf32> to vector<32x256xf32>
    %21 = arith.addf %19, %20 : vector<32x256xf32>
    %22 = math.tanh %21 : vector<32x256xf32>
    %c0_9 = arith.constant 0 : index
    %c0_10 = arith.constant 0 : index
    %23 = vector.load %arg6[%c0_9, %c0_10] : memref<32x1xf32, #tpu.memory_space<vmem>>, vector<32x1xf32>
    %c0_11 = arith.constant 0 : index
    %c0_12 = arith.constant 0 : index
    %24 = vector.load %arg7[%c0_11, %c0_12] : memref<1x1xf32, #tpu.memory_space<vmem>>, vector<1x1xf32>
    %25 = vector.broadcast %23 : vector<32x1xf32> to vector<32x256xf32>
    %26 = arith.mulf %25, %22 : vector<32x256xf32>
    %cst_13 = arith.constant dense<0.000000e+00> : vector<256xf32>
    %27 = vector.multi_reduction <add>, %26, %cst_13 [0] : vector<32x256xf32> to vector<256xf32>
    %28 = vector.shape_cast %27 : vector<256xf32> to vector<1x256xf32>
    %29 = vector.broadcast %24 : vector<1x1xf32> to vector<1x256xf32>
    %30 = arith.addf %28, %29 : vector<1x256xf32>
    %c0_14 = arith.constant 0 : index
    %c0_15 = arith.constant 0 : index
    %31 = vector.load %arg8[%c0_14, %c0_15] : memref<1x256xf32, #tpu.memory_space<vmem>>, vector<1x256xf32>
    tpu.vector_store %arg8[%c0_14, %c0_15], %30 {strides = array<i32>} : memref<1x256xf32, #tpu.memory_space<vmem>>, vector<1x256xf32>,
    return
  }
  func.func @transform_0(%arg0: i32) -> (i32, i32) {
    %c0_i32 = arith.constant 0 : i32
    %c0_i32_0 = arith.constant 0 : i32
    return %c0_i32, %arg0 : i32, i32
  }
  func.func @transform_1(%arg0: i32) -> (i32, i32) {
    %c0_i32 = arith.constant 0 : i32
    %c0_i32_0 = arith.constant 0 : i32
    %c0_i32_1 = arith.constant 0 : i32
    return %c0_i32, %c0_i32_0 : i32, i32
  }
  func.func @transform_2(%arg0: i32) -> (i32, i32) {
    %c0_i32 = arith.constant 0 : i32
    %c0_i32_0 = arith.constant 0 : i32
    %c0_i32_1 = arith.constant 0 : i32
    return %c0_i32, %c0_i32_0 : i32, i32
  }
  func.func @transform_3(%arg0: i32) -> (i32, i32) {
    %c0_i32 = arith.constant 0 : i32
    %c0_i32_0 = arith.constant 0 : i32
    %c0_i32_1 = arith.constant 0 : i32
    return %c0_i32, %c0_i32_0 : i32, i32
  }
  func.func @transform_4(%arg0: i32) -> (i32, i32) {
    %c0_i32 = arith.constant 0 : i32
    %c0_i32_0 = arith.constant 0 : i32
    %c0_i32_1 = arith.constant 0 : i32
    return %c0_i32, %c0_i32_0 : i32, i32
  }
  func.func @transform_5(%arg0: i32) -> (i32, i32) {
    %c0_i32 = arith.constant 0 : i32
    %c0_i32_0 = arith.constant 0 : i32
    %c0_i32_1 = arith.constant 0 : i32
    return %c0_i32, %c0_i32_0 : i32, i32
  }
  func.func @transform_6(%arg0: i32) -> (i32, i32) {
    %c0_i32 = arith.constant 0 : i32
    %c0_i32_0 = arith.constant 0 : i32
    %c0_i32_1 = arith.constant 0 : i32
    return %c0_i32, %c0_i32_0 : i32, i32
  }
  func.func @transform_7(%arg0: i32) -> (i32, i32) {
    %c0_i32 = arith.constant 0 : i32
    %c0_i32_0 = arith.constant 0 : i32
    return %c0_i32, %arg0 : i32, i32
  }
}

</mosaic_0001>

<bundles_post_ra>
// kernel: tpu_custom_call.1
= control target key start
LH: loop header
LB: loop body
LE: loop exit
PB: predicated region body
PF: predicated region fallthrough
CT: control target
= control target key end

     0   :  { %s1102_s0 = inlined_call_operand.vmem [shape: f32[2,512], index: 0, kind: input, shape index: {}]   ;;  %s1103_s1 = inlined_call_operand.vmem [shape: f32[32,2], index: 1, kind: input, shape index: {}]   ;;  %s1104_s2 = inlined_call_operand.vmem [shape: f32[32,1], index: 2, kind: input, shape index: {}]   ;;  %s1105_s3 = inlined_call_operand.vmem [shape: f32[32,32], index: 3, kind: input, shape index: {}]   ;;  %s1106_s4 = inlined_call_operand.vmem [shape: f32[32,1], index: 4, kind: input, shape index: {}]   ;;  %s1107_s5 = inlined_call_operand.vmem [shape: f32[32,1], index: 5, kind: input, shape index: {}]   ;;  %s1108_s6 = inlined_call_operand.<no memory space> [shape: f32[1,1], index: 6, kind: input, shape index: {}]   ;;  %s1109_s7 = inlined_call_operand.hbm [shape: f32[1,512], index: 7, kind: output, shape index: {}]  }
   0x1   :  { %v12_v0 = vstv %s1108_s6 }
   0x2   :  { %13 = vst [vmem:[#allocation2] sm:$0x1] %v12_v0 }
   0x3   :  { %14 = vsyncpa [#allocation4], 0 }
   0x4   :  { %16 = vsyncpa [#allocation4 + $0x1], 0  ;;  %s937_s26 = smov 0   ;;  %s939_s27 = smov 0  }
   0x5   :  { %s941_s28 = smov 0   ;;  %s943_s29 = smov 0  }
   0x6 LB: > { %s958_s6 = sadd.s32 4294967295, %s887_s29   ;;  %s721_s30 = sadd.s32 4294967294, %s887_s29   ;;  %s887_s29 = sphi %s943_s29, %s1115_s29   ;;  %s883_s28 = sphi %s941_s28, %s1114_s28   ;;  %s879_s27 = sphi %s939_s27, %s1113_s27   ;;  %s875_s26 = sphi %s937_s26, %s1112_s26  }
   0x7   : > { %s962_s8 = sadd.s32 1, %s887_s29   ;;  %s181_s9 = sadd.s32 1, %s883_s28 }
   0x8   : > { %s178_s10 = ssub.s32 %s887_s29, %s962_s8  ;;  %p191_p0 = scmp.ne.s32.totalorder %s883_s28, %s879_s27 }
   0x9   : > { %p179_p1 = scmp.eq.s32.totalorder %s178_s10, 0  ;;  %p192_p2 = scmp.eq.s32.totalorder %s958_s6, 1 }
   0xa   : > { %p197_p3 = scmp.ne.s32.totalorder %s879_s27, %s875_s26  ;;  %p198_p4 = scmp.eq.s32.totalorder %s721_s30, 1 }
   0xb   : > { %s973_s11 = scalar_select %p179_p1, %s883_s28, %s181_s9  }
   0xc   : > { %p975_p5 = por %p192_p2, %p191_p0  ;;  %p979_p6 = por %p198_p4, %p197_p3 }
   0xd   : > { %p724_p7 = scmp.ge.s32.totalorder %s887_s29, 1  ;;  %p243_p8 = scmp.lt.s32.totalorder %s887_s29, 3 }
   0xf   : > { %p244_p9 = pnand %p724_p7, %p243_p8 }
  0x10   : > { %s726_s16 = sshll.u32 (!%p244_p9), %s958_s6, 1  ;;  %s272_s14 = sand.u32 (!%p244_p9), 1, %s879_s27  }
  0x11   : > { %247 = sbr.rel (%p244_p9) target bundleno = 447 (0x1bf), region = 48  ;;  %p276_p10 = scmp.lt.s32.totalorder (!%p244_p9), %s726_s16, 3 }
  0x12   : > { %s725_s15 = sshll.u32 (!%p244_p9), %s272_s14, 1  ;;  %s648_s22 = scalar_lea.sflag (!%p244_p9), [#allocation4], %s272_s14 }
  0x13   : > { %s893_s24 = smov (!%p244_p9), [#allocation3]  }
  0x16   : > { %v290_v1 = vld [vmem:[%s1104_s2 + $0x18] sm:$0xff]  ;;  %v889_v3 = vmov 0   ;;  %v285_v4 = vld [vmem:[%s1103_s1 + $0x10] sm:$0xff]  ;;  %v890_v5 = vmov 1   ;;  %v284_v6 = vld [vmem:[%s1103_s1 + $0x8] sm:$0xff]  ;;  %v891_v15 = vmov 0.0   ;;  %v312_v21 = vlaneseq }
  0x17   : > { %v286_v2 = vld [vmem:[%s1103_s1 + $0x18] sm:$0xff]  ;;  %790 = vset.pattern.permute.xlu1 %v889_v3  ;;  %789 = vset.pattern.permute.xlu0 %v889_v3  ;;  %v289_v7 = vld [vmem:[%s1104_s2 + $0x10] sm:$0xff]  ;;  %v283_v8 = vld [vmem:[%s1103_s1] sm:$0xff]  ;;  %s1117_s16 = smov (!%p276_p10, %s726_s16), 3  ;;  %vm452_vm0 = vcmask 261120  }
  0x18   : > { %355 = vperm.xlu1 %790, %v290_v1   ;;  %308 = vperm.xlu0 %789, %v286_v2   ;;  %v288_v9 = vld [vmem:[%s1104_s2 + $0x8] sm:$0xff]  ;;  %v287_v10 = vld [vmem:[%s1104_s2] sm:$0xff]  ;;  %v430_v12 = vld [vmem:[%s1106_s4 + $0x10] sm:$0xff]  ;;  %s727_s17 = sshll.u32 %s1117_s16, 1  ;;  %v1037_v22 = vshrl.u32 %v312_v21, 7  ;;  %s737_s16 = sshll.u32 %s958_s6, 5 }
  0x19   : > { %v428_v11 = vld [vmem:[%s1106_s4] sm:$0xff]  ;;  %v431_v13 = vld [vmem:[%s1106_s4 + $0x18] sm:$0xff]  ;;  %v563_v14 = vld [vmem:[%s1107_s5 + $0x8] sm:$0xff]  ;;  %529 = vmatprep.mubr.f32.mxu0 %v891_v15  ;;  %541 = vmatprep.mubr.f32.mxu1 %v891_v15  ;;  %s279_s20 = scalar_lea.vmem %s1102_s0, %s727_s17  ;;  %s274_s17 = scalar_lea.vmem [#allocation3], %s725_s15  ;;  %vm644_vm1 = vcmp.lt.s32.totalorder %v312_v21, 256 }
  0x1a   : > { %v565_v16 = vld [vmem:[%s1107_s5 + $0x18] sm:$0xff]  ;;  %v429_v17 = vld [vmem:[%s1106_s4 + $0x8] sm:$0xff]  ;;  %v562_v18 = vld [vmem:[%s1107_s5] sm:$0xff]  ;;  %v1043_v23 = vsub.s32 0, %v1037_v22  ;;  %v318_v24 = vsub.s32 2, %v1037_v22  ;;  %v384_v28 = vsub.s32 1, %v1037_v22  ;;  %s660_s21 = scalar_lea.hbm %s1109_s7, %s737_s16 }
  0x1b   : > { %v564_v19 = vld [vmem:[%s1107_s5 + $0x10] sm:$0xff]  ;;  %v566_v20 = vld [vmem:[#allocation2] sm:$0x1]  ;;  %v388_v29 = vsub.s32 3, %v1037_v22  ;;  %s662_s18 = sshll.u32 %s274_s17, 4  ;;  %s831_s6 = sshll.u32 %s893_s24, 4  ;;  %s663_s18 = int_to_ptr.vmem [resolvable:$true] %s662_s18  ;;  %s832_s6 = int_to_ptr.vmem [resolvable:$false] %s831_s6 }
  0x1c   : > { %791 = vset.pattern.permute.xlu1 %v890_v5  ;;  %303 = vperm.xlu0 %789, %v285_v4   ;;  %v282_v25 = vld [vmem:[%s279_s20] sm:$0xf]  ;;  %s827_s23 = scalar_lea.vmem %s663_s18, 32  ;;  %s833_s25 = scalar_lea.vmem %s832_s6, 64 }
  0x1d   : > { %379 = vperm.xlu1 %791, %v286_v2   ;;  %v315_v26 = vrot.slane %v282_v25, %v1043_v23  ;;  %v319_v27 = vrot.slane %v282_v25, %v318_v24  ;;  %v385_v32 = vrot.slane %v282_v25, %v384_v28  ;;  %v389_v33 = vrot.slane %v282_v25, %v388_v29  ;;  %v426_v29 = vld [vmem:[%s1105_s3 + $0x10] sm:$0xff]  ;;  %p828_p11 = scmp.ne.s32.totalorder %s663_s18, %s827_s23  ;;  %p834_p0 = scmp.lt.s32.totalorder %s663_s18, %s832_s6 }
  0x1e   : > { %p835_p1 = scmp.lt.s32.totalorder %s833_s25, %s827_s23 }
  0x1f   : > { %v325_v30 = vrot.slane %v315_v26, %v1043_v23  ;;  %v329_v31 = vrot.slane %v319_v27, %v1043_v23  ;;  %v395_v38 = vrot.slane %v385_v32, %v384_v28  ;;  %v399_v39 = vrot.slane %v389_v33, %v384_v28  ;;  %v424_v28 = vld [vmem:[%s1105_s3] sm:$0xff]  ;;  %p829_p12 = pnand %p828_p11, %p975_p5 }
  0x20   : > { %298 = vperm.xlu0 %789, %v284_v6   ;;  %p836_p2 = por %p835_p1, %p834_p0 }
  0x21   : > { %792 = vset.pattern.permute.xlu1 %v889_v3  ;;  %p830_p13 = pneg %p829_p12 }
  0x22   : > { %350 = vperm.xlu1 %792, %v289_v7  }
  0x23   : > { %p837_p3 = pnand %p836_p2, %p830_p13 }
  0x24   : > { %793 = vset.pattern.permute.xlu0 %v890_v5 }
  0x25   : > { %375 = vperm.xlu0 %793, %v285_v4  }
  0x26   : > { %293 = vperm.xlu1 %792, %v283_v8  }
  0x29   : > { %371 = vperm.xlu0 %793, %v284_v6  }
  0x2a   : > { %345 = vperm.xlu1 %792, %v288_v9  }
  0x2d   : > { %367 = vperm.xlu0 %793, %v283_v8  }
  0x2e   : > { %340 = vperm.xlu1 %792, %v287_v10  }
  0x31   : > { %794 = vset.pattern.permute.xlu0 %v889_v3 }
  0x32   : > { %434 = vperm.xlu1 %792, %v428_v11   ;;  %439 = vperm.xlu0 %794, %v429_v17  }
  0x36   : > { %444 = vperm.xlu1 %792, %v430_v12   ;;  %569 = vperm.xlu0 %794, %v562_v18  }
  0x3a   : > { %449 = vperm.xlu1 %792, %v431_v13   ;;  %579 = vperm.xlu0 %794, %v564_v19  }
  0x3e   : > { %574 = vperm.xlu1 %792, %v563_v14   ;;  %615 = vperm.xlu0 %794, %v566_v20  }
  0x42   : > { %584 = vperm.xlu1 %792, %v565_v16  }
  0x93   : > { %v356_v34 = vpop.permute.xlu1 %355  ;;  %v309_v35 = vpop.permute.xlu0 %308 }
  0x94   : > { %v336_v36 = vmul.f32 %v325_v30, %v309_v35  ;;  %v337_v37 = vmul.f32 %v329_v31, %v309_v35 }
  0x96   : > { %v364_v42 = vadd.f32 %v356_v34, %v336_v36  ;;  %v365_v43 = vadd.f32 %v356_v34, %v337_v37 }
  0x97   : > { %v304_v40 = vpop.permute.xlu0 %303 }
  0x98   : > { %v380_v41 = vpop.permute.xlu1 %379  ;;  %v334_v50 = vmul.f32 %v325_v30, %v304_v40  ;;  %v335_v51 = vmul.f32 %v329_v31, %v304_v40 }
  0x99   : > { %v406_v44 = vmul.f32 %v395_v38, %v380_v41  ;;  %v407_v45 = vmul.f32 %v399_v39, %v380_v41 }
  0x9b   : > { %v414_v46 = vadd.f32 %v406_v44, %v364_v42  ;;  %v415_v47 = vadd.f32 %v407_v45, %v365_v43  ;;  %v299_v48 = vpop.permute.xlu0 %298 }
  0x9c   : > { %v332_v60 = vmul.f32 %v325_v30, %v299_v48  ;;  %v333_v61 = vmul.f32 %v329_v31, %v299_v48 }
  0x9d   : > { %795 = vtanh.f32 %v414_v46  ;;  %v351_v49 = vpop.permute.xlu1 %350 }
  0x9e   : > { %797 = vtanh.f32 %v415_v47  ;;  %v362_v53 = vadd.f32 %v351_v49, %v334_v50  ;;  %v363_v54 = vadd.f32 %v351_v49, %v335_v51 }
  0xa0   : > { %v376_v52 = vpop.permute.xlu0 %375 }
  0xa1   : > { %v404_v55 = vmul.f32 %v395_v38, %v376_v52  ;;  %v405_v56 = vmul.f32 %v399_v39, %v376_v52  ;;  %v294_v57 = vpop.permute.xlu1 %293 }
  0xa2   : > { %v330_v4 = vmul.f32 %v325_v30, %v294_v57  ;;  %v331_v5 = vmul.f32 %v329_v31, %v294_v57  ;;  %v425_v30 = vld [vmem:[%s1105_s3 + $0x8] sm:$0xff]  ;;  %v427_v31 = vld [vmem:[%s1105_s3 + $0x18] sm:$0xff] }
  0xa3   : > { %v412_v58 = vadd.f32 %v404_v55, %v362_v53  ;;  %v413_v59 = vadd.f32 %v405_v56, %v363_v54 }
  0xa4   : > { %v372_v62 = vpop.permute.xlu0 %371 }
  0xa5   : > { %799 = vtanh.f32 %v412_v58  ;;  %v402_v63 = vmul.f32 %v395_v38, %v372_v62  ;;  %v403_v0 = vmul.f32 %v399_v39, %v372_v62  ;;  %v346_v1 = vpop.permute.xlu1 %345 }
  0xa6   : > { %801 = vtanh.f32 %v413_v59  ;;  %v360_v2 = vadd.f32 %v346_v1, %v332_v60  ;;  %v361_v3 = vadd.f32 %v346_v1, %v333_v61 }
  0xa8   : > { %v410_v6 = vadd.f32 %v402_v63, %v360_v2  ;;  %v411_v7 = vadd.f32 %v403_v0, %v361_v3  ;;  %v368_v8 = vpop.permute.xlu0 %367 }
  0xa9   : > { %v400_v9 = vmul.f32 %v395_v38, %v368_v8  ;;  %v401_v10 = vmul.f32 %v399_v39, %v368_v8  ;;  %v341_v11 = vpop.permute.xlu1 %340 }
  0xaa   : > { %v796_v12 = vpop.eup %795  ;;  %803 = vtanh.f32 %v410_v6  ;;  %v358_v13 = vadd.f32 %v341_v11, %v330_v4  ;;  %v359_v14 = vadd.f32 %v341_v11, %v331_v5 }
  0xab   : > { %v798_v16 = vpop.eup %797  ;;  %805 = vtanh.f32 %v411_v7 }
  0xac   : > { %v408_v17 = vadd.f32 %v400_v9, %v358_v13  ;;  %v409_v18 = vadd.f32 %v401_v10, %v359_v14  ;;  %489 = vmatprep.subr.mxu0 %v798_v16  ;;  %738 = vmatprep.subr.mxu1 %v798_v16 }
  0xad   : > { %490 = vmatpush1.msra.mxu0 %v796_v12  ;;  %742 = vmatpush1.msra.mxu1 %v796_v12  ;;  %v435_v32 = vpop.permute.xlu1 %434 }
  0xae   : > { %807 = vtanh.f32 %v408_v17 }
  0xaf   : > { %809 = vtanh.f32 %v409_v18 }
  0xb1   : > { %v445_v33 = vpop.permute.xlu1 %444 }
  0xb2   : > { %v800_v19 = vpop.eup %799 }
  0xb3   : > { %v802_v20 = vpop.eup %801 }
  0xb4   : > { %491 = vmatprep.subr.mxu0 %v802_v20  ;;  %739 = vmatprep.subr.mxu1 %v802_v20 }
  0xb5   : > { %492 = vmatpush1.msra.mxu0 %v800_v19  ;;  %743 = vmatpush1.msra.mxu1 %v800_v19  ;;  %v450_v40 = vpop.permute.xlu1 %449 }
  0xb7   : > { %v804_v24 = vpop.eup %803 }
  0xb8   : > { %v806_v25 = vpop.eup %805 }
  0xb9   : > { %493 = vmatprep.subr.mxu0 %v806_v25  ;;  %740 = vmatprep.subr.mxu1 %v806_v25  ;;  %v575_v55 = vpop.permute.xlu1 %574 }
  0xba   : > { %494 = vmatpush1.msra.mxu0 %v804_v24  ;;  %744 = vmatpush1.msra.mxu1 %v804_v24  ;;  %v892_v24 = vmov 1966171168  }
  0xbb   : > { %v808_v26 = vpop.eup %807  ;;  %v628_v25 = vunpack.c.l.s4 %v892_v24 }
  0xbc   : > { %v810_v27 = vpop.eup %809 }
  0xbd   : > { %495 = vmatprep.subr.mxu0 %v810_v27  ;;  %741 = vmatprep.subr.mxu1 %v810_v27  ;;  %v585_v4 = vpop.permute.xlu1 %584 }
  0xbe   : > { %496 = vmatpush1.msra.mxu0 %v808_v26  ;;  %745 = vmatpush1.msra.mxu1 %v808_v26 }
  0xbf   : > { %728 = vmatmul.mubr.msk.f32.vlgmr.msra.gmra.mxu0 %vm452_vm0, %v424_v28  ;;  %730 = vmatmul.mubr.msk.f32.vlgmr.msra.gmra.mxu1 %vm452_vm0, %v426_v29 }
  0xc0   : > { %535 = vmatprep.mubr.f32.mxu0 %v891_v15  ;;  %547 = vmatprep.mubr.f32.mxu1 %v891_v15  ;;  %v440_v15 = vpop.permute.xlu0 %439 }
  0xc3   : > { %729 = vmatmul.mubr.msk.f32.gmra.mxu0 %vm452_vm0, %v425_v30  ;;  %731 = vmatmul.mubr.msk.f32.gmra.mxu1 %vm452_vm0, %v427_v31  ;;  %v629_v31 = vunpack.c.0.s8 %v628_v25 }
  0xc4   : > { %v570_v52 = vpop.permute.xlu0 %569 }
  0xc8   : > { %v580_v62 = vpop.permute.xlu0 %579 }
  0xcc   : > { %v616_v28 = vpop.permute.xlu0 %615 }
 0x17f   : > { %v531_v34 = vpop.f32.mrf.mxu0  ;;  %v543_v35 = vpop.f32.mrf.mxu1 }
 0x180   : > { %v532_v36 = vadd.f32 %v531_v34, %v435_v32  ;;  %v544_v37 = vadd.f32 %v543_v35, %v445_v33 }
 0x181   : > { %v533_v38 = vpop.f32.mrf.mxu0  ;;  %v545_v39 = vpop.f32.mrf.mxu1 }
 0x182   : > { %811 = vtanh.f32 %v532_v36  ;;  %v534_v41 = vadd.f32 %v533_v38, %v435_v32  ;;  %v546_v42 = vadd.f32 %v545_v39, %v445_v33  ;;  %v621_v32 = vrot.slane %v616_v28, %v1043_v23 }
 0x183   : > { %813 = vtanh.f32 %v544_v37  ;;  %v537_v43 = vpop.f32.mrf.mxu0  ;;  %v549_v44 = vpop.f32.mrf.mxu1  ;;  %v632_v36 = vsub.s32 %v629_v31, %v1037_v22 }
 0x184   : > { %815 = vtanh.f32 %v534_v41  ;;  %v538_v45 = vadd.f32 %v537_v43, %v440_v15  ;;  %v550_v46 = vadd.f32 %v549_v44, %v450_v40 }
 0x185   : > { %817 = vtanh.f32 %v546_v42  ;;  %v539_v47 = vpop.f32.mrf.mxu0  ;;  %v551_v48 = vpop.f32.mrf.mxu1 }
 0x186   : > { %819 = vtanh.f32 %v538_v45  ;;  %v540_v49 = vadd.f32 %v539_v47, %v440_v15  ;;  %v552_v50 = vadd.f32 %v551_v48, %v450_v40 }
 0x187   : > { %821 = vtanh.f32 %v550_v46 }
 0x188   : > { %823 = vtanh.f32 %v540_v49 }
 0x189   : > { %825 = vtanh.f32 %v552_v50 }
 0x18f   : > { %v812_v51 = vpop.eup %811 }
 0x190   : > { %v814_v53 = vpop.eup %813  ;;  %v587_v59 = vmul.f32 %v812_v51, %v570_v52 }
 0x191   : > { %v816_v54 = vpop.eup %815  ;;  %v591_v63 = vmul.f32 %v814_v53, %v580_v62 }
 0x192   : > { %v818_v56 = vpop.eup %817  ;;  %v588_v0 = vmul.f32 %v816_v54, %v570_v52 }
 0x193   : > { %v820_v57 = vpop.eup %819  ;;  %v592_v5 = vmul.f32 %v818_v56, %v580_v62 }
 0x194   : > { %v822_v58 = vpop.eup %821  ;;  %v589_v60 = vmul.f32 %v820_v57, %v575_v55 }
 0x195   : > { %v824_v61 = vpop.eup %823  ;;  %v593_v6 = vmul.f32 %v822_v58, %v585_v4 }
 0x196   : > { %v595_v1 = vadd.f32 %v589_v60, %v587_v59  ;;  %v590_v2 = vmul.f32 %v824_v61, %v575_v55  ;;  %v826_v3 = vpop.eup %825 }
 0x197   : > { %v594_v10 = vmul.f32 %v826_v3, %v585_v4 }
 0x198   : > { %v596_v7 = vadd.f32 %v595_v1, %v591_v63  ;;  %v604_v8 = vadd.f32 %v590_v2, %v588_v0 }
 0x19a   : > { %v597_v9 = vadd.f32 %v596_v7, %v593_v6  ;;  %v605_v11 = vadd.f32 %v604_v8, %v592_v5 }
 0x19c   : > { %v598_v12 = vrot.slane %v597_v9, 4  ;;  %v606_v13 = vadd.f32 %v605_v11, %v594_v10 }
 0x19e   : > { %v599_v14 = vadd.f32 %v598_v12, %v597_v9  ;;  %v607_v16 = vrot.slane %v606_v13, 4 }
 0x1a0   : > { %v600_v17 = vrot.slane %v599_v14, 2  ;;  %v608_v18 = vadd.f32 %v607_v16, %v606_v13 }
 0x1a2   : > { %v601_v19 = vadd.f32 %v600_v17, %v599_v14  ;;  %v609_v20 = vrot.slane %v608_v18, 2 }
 0x1a4   : > { %v602_v26 = vrot.slane %v601_v19, 1  ;;  %v610_v27 = vadd.f32 %v609_v20, %v608_v18 }
 0x1a6   : > { %v603_v29 = vadd.f32 %v602_v26, %v601_v19  ;;  %v611_v30 = vrot.slane %v610_v27, 1 }
 0x1a8   : > { %v612_v33 = vadd.f32 %v611_v30, %v610_v27  ;;  %v622_v34 = vadd.f32 %v621_v32, %v603_v29 }
 0x1aa   : > { %v623_v35 = vadd.f32 %v621_v32, %v612_v33 }
 0x1ac   : > { %v626_v37 = vcombine.low %v622_v34, %v623_v35 }
 0x1ae   : > { %v633_v38 = vrot.slane %v626_v37, %v632_v36 }
 0x1b0   : > { %v640_v39 = vrot.slane %v633_v38, %v632_v36 }
 0x1b2   : > { %646 = vst.msk [vmem:[%s274_s17] sm:$0x3] %vm644_vm1, %v640_v39 }
 0x1b3   : > { %840 = shalt.err (!%p837_p3)
}
 0x1b4   : > { %s841_s30 = scalar_lea.hbm %s660_s21, 32  ;;  %s845_s14 = scalar_lea.hbm %s1109_s7, 64 }
 0x1b5   : > { %p842_p4 = scmp.ne.s32.totalorder %s660_s21, %s841_s30  ;;  %p846_p9 = scmp.lt.s32.totalorder %s660_s21, %s1109_s7 }
 0x1b6   : > { %p847_p10 = scmp.lt.s32.totalorder %s845_s14, %s841_s30 }
 0x1b7   : > { %p843_p7 = pnand %p842_p4, %p975_p5 }
 0x1b8   : > { %p848_p11 = por %p847_p10, %p846_p9 }
 0x1b9   : > { %p844_p8 = pneg %p843_p7 }
 0x1bb   : > { %p849_p12 = pnand %p848_p11, %p844_p8 }
 0x1bd   : > { %852 = shalt.err (!%p849_p12)
}
 0x1be   : > { %746 = dma.vmem_to_hbm [thread:$0]  (%p975_p5), %s663_s18, 32, %s660_s21, %s648_s22  }
 0x1bf PF: > { %p752_p13 = scmp.ge.s32.totalorder %s887_s29, 2  ;;  %s674_s17 = sand.u32 1, %s875_s26  }
 0x1c0   : > { %s675_s19 = scalar_lea.sflag [#allocation4], %s674_s17 }
 0x1c1   : > { %p749_p0 = pnand %p752_p13, %p979_p6 }
 0x1c3   : > { %p750_p1 = pneg %p749_p0 }
 0x1c5   : > { %870 = dma.done.wait (%p750_p1), %s675_s19, 32  }
 0x1c6   : > { %872 = vsyncadd (%p750_p1), %s675_s19, 4294967264  ;;  %p19_p2 = scmp.ge.s32.totalorder %s962_s8, 4   ;;  %s1112_s26 = smov %s879_s27 }
 0x1c7   : > { %s1113_s27 = smov %s883_s28  ;;  %s1114_s28 = smov %s973_s11 }
 0x1c8   : > { %s1115_s29 = smov %s962_s8  ;;  %21 = sbr.rel (!%p19_p2) target bundleno = 6 (0x6), region = 83 }
 0x1cd   :  { %680 = vsyncpa [#allocation4], 1 }
 0x1ce   :  { %682 = vsyncpa [#allocation4 + $0x1], 1 }

</bundles_post_ra>
